<compile_context>
chip_gen: v7x
topology: tpu7x:2x2x1
jax: 0.10.0
libtpu: 0.0.40
codegen_flags: <defaults>
</compile_context>

<pallas_src>
import functools

import jax
import jax.numpy as jnp
from jax.experimental import pallas as pl
from jax.experimental.pallas import tpu as pltpu

_LANE = 128
_SMOOTH = 0.0001


def _soft_dice_kernel(t_ref, logits_ref, targets_ref, out_ref,
                      inter_acc, s1_acc, s2_acc):
    # t_ref        : SMEM (1,) f32 threshold
    # logits_ref   : VMEM (N, TF) native dtype (feature tile)
    # targets_ref  : VMEM (N, TF) native dtype (feature tile)
    # out_ref      : SMEM (1,) f32 scalar loss
    # *_acc        : VMEM (N, 128) f32 per-lane partial counts (persist over grid)
    k = pl.program_id(0)

    @pl.when(k == 0)
    def _init():
        inter_acc[...] = jnp.zeros_like(inter_acc)
        s1_acc[...] = jnp.zeros_like(s1_acc)
        s2_acc[...] = jnp.zeros_like(s2_acc)

    t = t_ref[0]
    # Compare in f32 (upcast of the VMEM tile is cheap; HBM traffic stays native-width).
    x = logits_ref[...].astype(jnp.float32)
    y = targets_ref[...].astype(jnp.float32)
    m1 = jnp.where(x >= t, 1.0, 0.0)  # (N, TF) f32
    m2 = jnp.where(y >= t, 1.0, 0.0)

    n, tf = m1.shape
    n_chunks = tf // _LANE

    # Fold the tile into (N, 128) per-lane partials with static lane-aligned
    # slices -> pure VPU adds, no XLU work in the streaming loop.
    i_acc = inter_acc[...]
    a_acc = s1_acc[...]
    b_acc = s2_acc[...]
    for c in range(n_chunks):
        lo = c * _LANE
        m1c = m1[:, lo:lo + _LANE]
        m2c = m2[:, lo:lo + _LANE]
        i_acc = i_acc + m1c * m2c
        a_acc = a_acc + m1c
        b_acc = b_acc + m2c
    inter_acc[...] = i_acc
    s1_acc[...] = a_acc
    s2_acc[...] = b_acc

    @pl.when(k == pl.num_programs(0) - 1)
    def _finalize():
        smooth = jnp.float32(_SMOOTH)
        inter = jnp.sum(inter_acc[...], axis=1, keepdims=True)  # (N, 1)
        s1 = jnp.sum(s1_acc[...], axis=1, keepdims=True)
        s2 = jnp.sum(s2_acc[...], axis=1, keepdims=True)
        # approx=False keeps the epilogue exact (matches the torch reference to ~1e-6).
        score = (inter + smooth) * pl.reciprocal(s1 + s2 + smooth, approx=False)
        out_ref[0] = jnp.float32(1.0) - jnp.float32(2.0) * jnp.sum(score) / jnp.float32(n)


def _below_threshold_pad(dtype):
    """A pad value guaranteed to compare `< t` for any realistic threshold."""
    if jnp.issubdtype(dtype, jnp.floating):
        return jnp.array(-jnp.inf, dtype=dtype)
    return jnp.array(jnp.iinfo(dtype).min, dtype=dtype)


@functools.partial(jax.jit, static_argnames=("lane_tile",))
def soft_dice_loss(logits, targets, t, *, lane_tile=2048):
    """Pallas-backed SoftDiceLoss.forward(logits, targets, t)."""
    num = logits.shape[0]
    m1 = logits.reshape(num, -1)   # (N, F), native dtype (no f32 copy in HBM)
    m2 = targets.reshape(num, -1)  # (N, F), native dtype
    f = m1.shape[1]

    # Feature tile: multiple of 128 lanes, capped at `lane_tile` (tiny vs. VMEM
    # on all of v5e/v6e/v7x: 2 inputs x 2 buffers x N x TF elems).
    f128 = pl.cdiv(f, _LANE) * _LANE
    tf = min(lane_tile, f128)
    f_pad = pl.cdiv(f, tf) * tf
    pad = f_pad - f
    if pad > 0:
        # Pad with sub-threshold values so padded columns contribute 0 counts.
        m1 = jnp.pad(m1, ((0, 0), (0, pad)), mode="constant",
                     constant_values=_below_threshold_pad(m1.dtype))
        m2 = jnp.pad(m2, ((0, 0), (0, pad)), mode="constant",
                     constant_values=_below_threshold_pad(m2.dtype))

    t_arr = jnp.asarray(t, dtype=jnp.float32).reshape(1)
    grid = (f_pad // tf,)

    # TODO(synk): on v7x a second 'parallel' grid axis over N (with per-row
    # partial outputs combined in the wrapper) would let both TensorCores
    # stream concurrently; kept single-axis here since the output is a scalar.
    out = pl.pallas_call(
        _soft_dice_kernel,
        out_shape=jax.ShapeDtypeStruct((1,), jnp.float32),
        grid=grid,
        in_specs=[
            pl.BlockSpec(memory_space=pltpu.MemorySpace.SMEM),     # threshold t
            pl.BlockSpec((num, tf), lambda k: (0, k)),             # logits tile
            pl.BlockSpec((num, tf), lambda k: (0, k)),             # targets tile
        ],
        out_specs=pl.BlockSpec(memory_space=pltpu.MemorySpace.SMEM),
        scratch_shapes=[
            pltpu.VMEM((num, _LANE), jnp.float32),  # intersection partials
            pltpu.VMEM((num, _LANE), jnp.float32),  # m1 partials
            pltpu.VMEM((num, _LANE), jnp.float32),  # m2 partials
        ],
        compiler_params=pltpu.CompilerParams(
            dimension_semantics=("arbitrary",)),
    )(t_arr, m1, m2)
    return out[0]


def soft_dice_loss_ref(logits, targets, t):
    """Pure-JAX reference mirroring the PyTorch semantics."""
    num = logits.shape[0]
    smooth = _SMOOTH
    m1 = (logits.reshape(num, -1) >= t).astype(jnp.float32)
    m2 = (targets.reshape(num, -1) >= t).astype(jnp.float32)
    inter = (m1 * m2).sum(1)
    score = (inter + smooth) / (m1.sum(1) + m2.sum(1) + smooth)
    return 1.0 - 2.0 * score.sum() / num


if __name__ == "__main__":
    key = jax.random.PRNGKey(0)
    k1, k2 = jax.random.split(key)

    N, C, H, W = 2, 4, 16, 16
    logits = jax.random.uniform(k1, (N, C, H, W), dtype=jnp.float32)            # NCHW
    targets = (jax.random.uniform(k2, (N, C, H, W)) > 0.5).astype(jnp.float32)  # NCHW
    t = 0.5

    loss = soft_dice_loss(logits, targets, t)
    jax.block_until_ready(loss)

    ref = soft_dice_loss_ref(logits, targets, t)
    assert jnp.allclose(loss, ref, atol=1e-5, rtol=1e-5), (loss, ref)

    # Also exercise a padded / multi-block path (F not a multiple of the tile).
    N2, F2 = 3, 3000
    xa = jax.random.uniform(k1, (N2, F2), dtype=jnp.float32)
    xb = (jax.random.uniform(k2, (N2, F2)) > 0.5).astype(jnp.float32)
    loss2 = soft_dice_loss(xa, xb, t, lane_tile=1024)
    jax.block_until_ready(loss2)
    ref2 = soft_dice_loss_ref(xa, xb, t)
    assert jnp.allclose(loss2, ref2, atol=1e-5, rtol=1e-5), (loss2, ref2)

    print("KERNEL_OK")
</pallas_src>

<mosaic_0001>
module attributes {stable_mosaic.version = 11 : i64} {
  func.func @_soft_dice_kernel(%arg0: i32, %arg1: memref<1xf32, #tpu.memory_space<smem>>, %arg2: memref<2x1024xf32, #tpu.memory_space<vmem>>, %arg3: memref<2x1024xf32, #tpu.memory_space<vmem>>, %arg4: memref<1xf32, #tpu.memory_space<smem>>, %arg5: memref<2x128xf32, #tpu.memory_space<vmem>>, %arg6: memref<2x128xf32, #tpu.memory_space<vmem>>, %arg7: memref<2x128xf32, #tpu.memory_space<vmem>>) attributes {dimension_semantics = [#tpu.dimension_semantics<arbitrary>], iteration_bounds = array<i64: 1>, scalar_prefetch = 0 : i64, scratch_operands = 3 : i64, tpu.core_type = #tpu.core_type<tc>, window_params = [{transform_indices = @transform_0, window_bounds = array<i64: 1>}, {transform_indices = @transform_1, window_bounds = array<i64: 2, 1024>}, {transform_indices = @transform_2, window_bounds = array<i64: 2, 1024>}, {transform_indices = @transform_3, window_bounds = array<i64: 1>}]} {
    %c0_i32 = arith.constant 0 : i32
    %0 = arith.cmpi eq, %arg0, %c0_i32 : i32
    %1 = arith.extui %0 : i1 to i32
    %c0_i32_0 = arith.constant 0 : i32
    %2 = arith.cmpi ne, %1, %c0_i32_0 : i32
    scf.if %2 {
      %cst_22 = arith.constant 0.000000e+00 : f32
      %73 = vector.broadcast %cst_22 : f32 to vector<2x128xf32>
      %c0_23 = arith.constant 0 : index
      %c0_24 = arith.constant 0 : index
      %74 = vector.load %arg5[%c0_23, %c0_24] : memref<2x128xf32, #tpu.memory_space<vmem>>, vector<2x128xf32>
      tpu.vector_store %arg5[%c0_23, %c0_24], %73 {strides = array<i32>} : memref<2x128xf32, #tpu.memory_space<vmem>>, vector<2x128xf32>,
      %cst_25 = arith.constant 0.000000e+00 : f32
      %75 = vector.broadcast %cst_25 : f32 to vector<2x128xf32>
      %c0_26 = arith.constant 0 : index
      %c0_27 = arith.constant 0 : index
      %76 = vector.load %arg6[%c0_26, %c0_27] : memref<2x128xf32, #tpu.memory_space<vmem>>, vector<2x128xf32>
      tpu.vector_store %arg6[%c0_26, %c0_27], %75 {strides = array<i32>} : memref<2x128xf32, #tpu.memory_space<vmem>>, vector<2x128xf32>,
      %cst_28 = arith.constant 0.000000e+00 : f32
      %77 = vector.broadcast %cst_28 : f32 to vector<2x128xf32>
      %c0_29 = arith.constant 0 : index
      %c0_30 = arith.constant 0 : index
      %78 = vector.load %arg7[%c0_29, %c0_30] : memref<2x128xf32, #tpu.memory_space<vmem>>, vector<2x128xf32>
      tpu.vector_store %arg7[%c0_29, %c0_30], %77 {strides = array<i32>} : memref<2x128xf32, #tpu.memory_space<vmem>>, vector<2x128xf32>,
    } else {
    }
    %c0 = arith.constant 0 : index
    %3 = memref.load %arg1[%c0] : memref<1xf32, #tpu.memory_space<smem>>
    %c0_1 = arith.constant 0 : index
    %c0_2 = arith.constant 0 : index
    %4 = vector.load %arg2[%c0_1, %c0_2] : memref<2x1024xf32, #tpu.memory_space<vmem>>, vector<2x1024xf32>
    %c0_3 = arith.constant 0 : index
    %c0_4 = arith.constant 0 : index
    %5 = vector.load %arg3[%c0_3, %c0_4] : memref<2x1024xf32, #tpu.memory_space<vmem>>, vector<2x1024xf32>
    %6 = vector.broadcast %3 : f32 to vector<2x1024xf32>
    %7 = arith.cmpf oge, %4, %6 : vector<2x1024xf32>
    %cst = arith.constant 1.000000e+00 : f32
    %cst_5 = arith.constant 0.000000e+00 : f32
    %8 = vector.broadcast %cst : f32 to vector<2x1024xf32>
    %9 = vector.broadcast %cst_5 : f32 to vector<2x1024xf32>
    %10 = arith.select %7, %8, %9 : vector<2x1024xi1>, vector<2x1024xf32>
    %11 = vector.broadcast %3 : f32 to vector<2x1024xf32>
    %12 = arith.cmpf oge, %5, %11 : vector<2x1024xf32>
    %cst_6 = arith.constant 1.000000e+00 : f32
    %cst_7 = arith.constant 0.000000e+00 : f32
    %13 = vector.broadcast %cst_6 : f32 to vector<2x1024xf32>
    %14 = vector.broadcast %cst_7 : f32 to vector<2x1024xf32>
    %15 = arith.select %12, %13, %14 : vector<2x1024xi1>, vector<2x1024xf32>
    %c0_8 = arith.constant 0 : index
    %c0_9 = arith.constant 0 : index
    %16 = vector.load %arg5[%c0_8, %c0_9] : memref<2x128xf32, #tpu.memory_space<vmem>>, vector<2x128xf32>
    %c0_10 = arith.constant 0 : index
    %c0_11 = arith.constant 0 : index
    %17 = vector.load %arg6[%c0_10, %c0_11] : memref<2x128xf32, #tpu.memory_space<vmem>>, vector<2x128xf32>
    %c0_12 = arith.constant 0 : index
    %c0_13 = arith.constant 0 : index
    %18 = vector.load %arg7[%c0_12, %c0_13] : memref<2x128xf32, #tpu.memory_space<vmem>>, vector<2x128xf32>
    %19 = vector.extract_strided_slice %10 {offsets = [0, 0], sizes = [2, 128], strides = [1, 1]} : vector<2x1024xf32> to vector<2x128xf32>
    %20 = vector.extract_strided_slice %15 {offsets = [0, 0], sizes = [2, 128], strides = [1, 1]} : vector<2x1024xf32> to vector<2x128xf32>
    %21 = arith.mulf %19, %20 : vector<2x128xf32>
    %22 = arith.addf %16, %21 : vector<2x128xf32>
    %23 = arith.addf %17, %19 : vector<2x128xf32>
    %24 = arith.addf %18, %20 : vector<2x128xf32>
    %25 = vector.extract_strided_slice %10 {offsets = [0, 128], sizes = [2, 128], strides = [1, 1]} : vector<2x1024xf32> to vector<2x128xf32>
    %26 = vector.extract_strided_slice %15 {offsets = [0, 128], sizes = [2, 128], strides = [1, 1]} : vector<2x1024xf32> to vector<2x128xf32>
    %27 = arith.mulf %25, %26 : vector<2x128xf32>
    %28 = arith.addf %22, %27 : vector<2x128xf32>
    %29 = arith.addf %23, %25 : vector<2x128xf32>
    %30 = arith.addf %24, %26 : vector<2x128xf32>
    %31 = vector.extract_strided_slice %10 {offsets = [0, 256], sizes = [2, 128], strides = [1, 1]} : vector<2x1024xf32> to vector<2x128xf32>
    %32 = vector.extract_strided_slice %15 {offsets = [0, 256], sizes = [2, 128], strides = [1, 1]} : vector<2x1024xf32> to vector<2x128xf32>
    %33 = arith.mulf %31, %32 : vector<2x128xf32>
    %34 = arith.addf %28, %33 : vector<2x128xf32>
    %35 = arith.addf %29, %31 : vector<2x128xf32>
    %36 = arith.addf %30, %32 : vector<2x128xf32>
    %37 = vector.extract_strided_slice %10 {offsets = [0, 384], sizes = [2, 128], strides = [1, 1]} : vector<2x1024xf32> to vector<2x128xf32>
    %38 = vector.extract_strided_slice %15 {offsets = [0, 384], sizes = [2, 128], strides = [1, 1]} : vector<2x1024xf32> to vector<2x128xf32>
    %39 = arith.mulf %37, %38 : vector<2x128xf32>
    %40 = arith.addf %34, %39 : vector<2x128xf32>
    %41 = arith.addf %35, %37 : vector<2x128xf32>
    %42 = arith.addf %36, %38 : vector<2x128xf32>
    %43 = vector.extract_strided_slice %10 {offsets = [0, 512], sizes = [2, 128], strides = [1, 1]} : vector<2x1024xf32> to vector<2x128xf32>
    %44 = vector.extract_strided_slice %15 {offsets = [0, 512], sizes = [2, 128], strides = [1, 1]} : vector<2x1024xf32> to vector<2x128xf32>
    %45 = arith.mulf %43, %44 : vector<2x128xf32>
    %46 = arith.addf %40, %45 : vector<2x128xf32>
    %47 = arith.addf %41, %43 : vector<2x128xf32>
    %48 = arith.addf %42, %44 : vector<2x128xf32>
    %49 = vector.extract_strided_slice %10 {offsets = [0, 640], sizes = [2, 128], strides = [1, 1]} : vector<2x1024xf32> to vector<2x128xf32>
    %50 = vector.extract_strided_slice %15 {offsets = [0, 640], sizes = [2, 128], strides = [1, 1]} : vector<2x1024xf32> to vector<2x128xf32>
    %51 = arith.mulf %49, %50 : vector<2x128xf32>
    %52 = arith.addf %46, %51 : vector<2x128xf32>
    %53 = arith.addf %47, %49 : vector<2x128xf32>
    %54 = arith.addf %48, %50 : vector<2x128xf32>
    %55 = vector.extract_strided_slice %10 {offsets = [0, 768], sizes = [2, 128], strides = [1, 1]} : vector<2x1024xf32> to vector<2x128xf32>
    %56 = vector.extract_strided_slice %15 {offsets = [0, 768], sizes = [2, 128], strides = [1, 1]} : vector<2x1024xf32> to vector<2x128xf32>
    %57 = arith.mulf %55, %56 : vector<2x128xf32>
    %58 = arith.addf %52, %57 : vector<2x128xf32>
    %59 = arith.addf %53, %55 : vector<2x128xf32>
    %60 = arith.addf %54, %56 : vector<2x128xf32>
    %61 = vector.extract_strided_slice %10 {offsets = [0, 896], sizes = [2, 128], strides = [1, 1]} : vector<2x1024xf32> to vector<2x128xf32>
    %62 = vector.extract_strided_slice %15 {offsets = [0, 896], sizes = [2, 128], strides = [1, 1]} : vector<2x1024xf32> to vector<2x128xf32>
    %63 = arith.mulf %61, %62 : vector<2x128xf32>
    %64 = arith.addf %58, %63 : vector<2x128xf32>
    %65 = arith.addf %59, %61 : vector<2x128xf32>
    %66 = arith.addf %60, %62 : vector<2x128xf32>
    %c0_14 = arith.constant 0 : index
    %c0_15 = arith.constant 0 : index
    %67 = vector.load %arg5[%c0_14, %c0_15] : memref<2x128xf32, #tpu.memory_space<vmem>>, vector<2x128xf32>
    tpu.vector_store %arg5[%c0_14, %c0_15], %64 {strides = array<i32>} : memref<2x128xf32, #tpu.memory_space<vmem>>, vector<2x128xf32>,
    %c0_16 = arith.constant 0 : index
    %c0_17 = arith.constant 0 : index
    %68 = vector.load %arg6[%c0_16, %c0_17] : memref<2x128xf32, #tpu.memory_space<vmem>>, vector<2x128xf32>
    tpu.vector_store %arg6[%c0_16, %c0_17], %65 {strides = array<i32>} : memref<2x128xf32, #tpu.memory_space<vmem>>, vector<2x128xf32>,
    %c0_18 = arith.constant 0 : index
    %c0_19 = arith.constant 0 : index
    %69 = vector.load %arg7[%c0_18, %c0_19] : memref<2x128xf32, #tpu.memory_space<vmem>>, vector<2x128xf32>
    tpu.vector_store %arg7[%c0_18, %c0_19], %66 {strides = array<i32>} : memref<2x128xf32, #tpu.memory_space<vmem>>, vector<2x128xf32>,
    %c0_i32_20 = arith.constant 0 : i32
    %70 = arith.cmpi eq, %arg0, %c0_i32_20 : i32
    %71 = arith.extui %70 : i1 to i32
    %c0_i32_21 = arith.constant 0 : i32
    %72 = arith.cmpi ne, %71, %c0_i32_21 : i32
    scf.if %72 {
      %c0_22 = arith.constant 0 : index
      %c0_23 = arith.constant 0 : index
      %73 = vector.load %arg5[%c0_22, %c0_23] : memref<2x128xf32, #tpu.memory_space<vmem>>, vector<2x128xf32>
      %cst_24 = arith.constant dense<0.000000e+00> : vector<2xf32>
      %74 = vector.multi_reduction <add>, %73, %cst_24 [1] : vector<2x128xf32> to vector<2xf32>
      %75 = vector.shape_cast %74 : vector<2xf32> to vector<2x1xf32>
      %c0_25 = arith.constant 0 : index
      %c0_26 = arith.constant 0 : index
      %76 = vector.load %arg6[%c0_25, %c0_26] : memref<2x128xf32, #tpu.memory_space<vmem>>, vector<2x128xf32>
      %cst_27 = arith.constant dense<0.000000e+00> : vector<2xf32>
      %77 = vector.multi_reduction <add>, %76, %cst_27 [1] : vector<2x128xf32> to vector<2xf32>
      %78 = vector.shape_cast %77 : vector<2xf32> to vector<2x1xf32>
      %c0_28 = arith.constant 0 : index
      %c0_29 = arith.constant 0 : index
      %79 = vector.load %arg7[%c0_28, %c0_29] : memref<2x128xf32, #tpu.memory_space<vmem>>, vector<2x128xf32>
      %cst_30 = arith.constant dense<0.000000e+00> : vector<2xf32>
      %80 = vector.multi_reduction <add>, %79, %cst_30 [1] : vector<2x128xf32> to vector<2xf32>
      %81 = vector.shape_cast %80 : vector<2xf32> to vector<2x1xf32>
      %cst_31 = arith.constant 9.99999974E-5 : f32
      %82 = vector.broadcast %cst_31 : f32 to vector<2x1xf32>
      %83 = arith.addf %75, %82 : vector<2x1xf32>
      %84 = arith.addf %78, %81 : vector<2x1xf32>
      %cst_32 = arith.constant 9.99999974E-5 : f32
      %85 = vector.broadcast %cst_32 : f32 to vector<2x1xf32>
      %86 = arith.addf %84, %85 : vector<2x1xf32>
      %87 = tpu.reciprocal %86 : vector<2x1xf32> -> vector<2x1xf32>
      %88 = arith.mulf %83, %87 : vector<2x1xf32>
      %89 = vector.shape_cast %88 : vector<2x1xf32> to vector<1x2x1xf32>
      %cst_33 = arith.constant dense<0.000000e+00> : vector<1xf32>
      %90 = vector.multi_reduction <add>, %89, %cst_33 [1, 2] : vector<1x2x1xf32> to vector<1xf32>
      %91 = vector.shape_cast %90 : vector<1xf32> to vector<1x1x1xf32>
      %92 = vector.extract %91[0, 0, 0] : f32 from vector<1x1x1xf32>
      %cst_34 = arith.constant 2.000000e+00 : f32
      %93 = arith.mulf %cst_34, %92 : f32
      %cst_35 = arith.constant 2.000000e+00 : f32
      %94 = arith.divf %93, %cst_35 : f32
      %cst_36 = arith.constant 1.000000e+00 : f32
      %95 = arith.subf %cst_36, %94 : f32
      %c0_37 = arith.constant 0 : index
      %96 = memref.load %arg4[%c0_37] : memref<1xf32, #tpu.memory_space<smem>>
      memref.store %95, %arg4[%c0_37] : memref<1xf32, #tpu.memory_space<smem>>
    } else {
    }
    return
  }
  func.func @transform_0(%arg0: i32) -> i32 {
    %c0_i32 = arith.constant 0 : i32
    %c0_i32_0 = arith.constant 0 : i32
    return %c0_i32 : i32
  }
  func.func @transform_1(%arg0: i32) -> (i32, i32) {
    %c0_i32 = arith.constant 0 : i32
    %c0_i32_0 = arith.constant 0 : i32
    return %c0_i32, %arg0 : i32, i32
  }
  func.func @transform_2(%arg0: i32) -> (i32, i32) {
    %c0_i32 = arith.constant 0 : i32
    %c0_i32_0 = arith.constant 0 : i32
    return %c0_i32, %arg0 : i32, i32
  }
  func.func @transform_3(%arg0: i32) -> i32 {
    %c0_i32 = arith.constant 0 : i32
    %c0_i32_0 = arith.constant 0 : i32
    return %c0_i32 : i32
  }
}

</mosaic_0001>

<bundles_post_ra>
// kernel: soft_dice_loss.1
= control target key start
LH: loop header
LB: loop body
LE: loop exit
PB: predicated region body
PF: predicated region fallthrough
CT: control target
= control target key end

     0   :  { %v55_v3 = vlaneseq  ;;  %v254_v5 = vmov 0.0   ;;  %v255_v6 = vmov 1983009808   ;;  %s314_s0 = inlined_call_operand.<no memory space> [shape: f32[1], index: 0, kind: input, shape index: {}]   ;;  %s315_s1 = inlined_call_operand.vmem [shape: f32[2,1024], index: 1, kind: input, shape index: {}]   ;;  %s316_s2 = inlined_call_operand.vmem [shape: f32[2,1024], index: 2, kind: input, shape index: {}]   ;;  %s317_s3 = inlined_call_operand.hbm [shape: f32[1], index: 3, kind: output, shape index: {}]  }
   0x1   :  { %v24_v0 = vld [vmem:[%s315_s1] sm:$0xff]  ;;  %v25_v1 = vld [vmem:[%s315_s1 + $0x8] sm:$0xff]  ;;  %v28_v2 = vstv %s314_s0  ;;  %21 = vst [vmem:[#allocation3] sm:$0x3] %v254_v5  ;;  %v53_v7 = vunpack.c.l.s4 %v255_v6  ;;  %20 = vst [vmem:[#allocation2] sm:$0x3] %v254_v5 }
   0x2   :  { %v26_v4 = vld [vmem:[%s316_s2] sm:$0xff]  ;;  %vm29_vm0 = vcmp.ge.f32.partialorder %v24_v0, %v28_v2  ;;  %22 = vst [vmem:[#allocation4] sm:$0x3] %v254_v5  ;;  %v27_v8 = vld [vmem:[%s316_s2 + $0x8] sm:$0xff] }
   0x3   :  { %9 = vsyncpa [#allocation7], 0  ;;  %vm30_vm1 = vcmp.ge.f32.partialorder %v25_v1, %v28_v2  ;;  %v31_v9 = vsel %vm29_vm0, 1.0, %v254_v5  ;;  %v56_v10 = vshrl.u32 %v55_v3, 7  ;;  %vm33_vm2 = vcmp.ge.f32.partialorder %v26_v4, %v28_v2  ;;  %s242_s25 = scalar_lea.hbm %s317_s3, 16 }
   0x4   :  { %v54_v11 = vunpack.c.0.s8 %v53_v7  ;;  %v78_v12 = vcombine.high %v31_v9, %v31_v9  ;;  %vm34_vm3 = vcmp.ge.f32.partialorder %v27_v8, %v28_v2  ;;  %v35_v13 = vsel %vm33_vm2, 1.0, %v254_v5  ;;  %p243_p0 = scmp.ne.s32.totalorder %s317_s3, %s242_s25  ;;  %p246_p1 = scmp.lt.u32.totalorder %s242_s25, %s317_s3 }
   0x5   :  { %v292_v14 = vsel %vm30_vm1, 1.0, %v254_v5  ;;  %v88_v16 = vcombine.high %v35_v13, %v35_v13  ;;  %v36_v17 = vsel %vm34_vm3, 1.0, %v254_v5  ;;  %v40_v18 = vmul.f32 %v35_v13, %v31_v9 }
   0x6   :  { %v57_v15 = vsub.s32 %v54_v11, %v56_v10  ;;  %v45_v19 = vrot.slane %v31_v9, 2  ;;  %v72_v20 = vrot.slane %v31_v9, 4  ;;  %v48_v23 = vrot.slane %v35_v13, 2  ;;  %p248_p2 = pnand %p246_p1, %p243_p0 }
   0x7   :  { %v74_v24 = vrot.slane %v35_v13, 4  ;;  %v148_v26 = vcombine.high %v292_v14, %v292_v14  ;;  %v158_v33 = vcombine.high %v36_v17, %v36_v17  ;;  %v98_v34 = vrot.slane %v31_v9, 6 }
   0x8   :  { %v58_v21 = vrot.slane %v31_v9, %v57_v15  ;;  %v85_v22 = vrot.slane %v78_v12, %v57_v15  ;;  %v38_v25 = vld [vmem:[#allocation3] sm:$0x3]  ;;  %v68_v28 = vrot.slane %v35_v13, %v57_v15  ;;  %v95_v29 = vrot.slane %v88_v16, %v57_v15  ;;  %v37_v30 = vld [vmem:[#allocation2] sm:$0x3] }
   0x9   :  { %v39_v27 = vld [vmem:[#allocation4] sm:$0x3]  ;;  %v42_v31 = vadd.f32 %v38_v25, %v31_v9  ;;  %v128_v35 = vrot.slane %v292_v14, %v57_v15  ;;  %v100_v38 = vrot.slane %v35_v13, 6  ;;  %v138_v41 = vrot.slane %v36_v17, %v57_v15 }
   0xa   :  { %v59_v32 = vcombine.high %v58_v21, %v58_v21  ;;  %v43_v36 = vadd.f32 %v39_v27, %v35_v13  ;;  %v69_v37 = vcombine.high %v68_v28, %v68_v28  ;;  %v104_v40 = vcombine.high %v85_v22, %v85_v22 }
   0xb   :  { %v41_v42 = vadd.f32 %v40_v18, %v37_v30  ;;  %v107_v44 = vcombine.high %v95_v29, %v95_v29  ;;  %v50_v45 = vmul.f32 %v48_v23, %v45_v19  ;;  %v76_v46 = vmul.f32 %v74_v24, %v72_v20 }
   0xc   :  { %v61_v39 = vadd.f32 %v59_v32, %v42_v31  ;;  %v71_v43 = vadd.f32 %v69_v37, %v43_v36  ;;  %v155_v48 = vrot.slane %v148_v26, %v57_v15  ;;  %v115_v49 = vrot.slane %v292_v14, 2 }
   0xd   :  { %v118_v50 = vrot.slane %v36_v17, 2  ;;  %v165_v52 = vrot.slane %v158_v33, %v57_v15  ;;  %v51_v53 = vadd.f32 %v50_v45, %v41_v42  ;;  %v102_v54 = vmul.f32 %v100_v38, %v98_v34 }
   0xe   :  { %v87_v47 = vadd.f32 %v85_v22, %v61_v39  ;;  %v97_v51 = vadd.f32 %v95_v29, %v71_v43  ;;  %v129_v56 = vcombine.high %v128_v35, %v128_v35  ;;  %v139_v57 = vcombine.high %v138_v41, %v138_v41 }
   0xf   :  { %v110_v58 = vmul.f32 %v36_v17, %v292_v14  ;;  %v77_v60 = vadd.f32 %v76_v46, %v51_v53  ;;  %v142_v61 = vrot.slane %v292_v14, 4  ;;  %v144_v62 = vrot.slane %v36_v17, 4 }
  0x10   :  { %v106_v55 = vadd.f32 %v104_v40, %v87_v47  ;;  %v109_v59 = vadd.f32 %v107_v44, %v97_v51  ;;  %v120_v0 = vmul.f32 %v118_v50, %v115_v49  ;;  %v168_v3 = vrot.slane %v292_v14, 6 }
  0x11   :  { %v103_v2 = vadd.f32 %v102_v54, %v77_v60  ;;  %v170_v4 = vrot.slane %v36_v17, 6  ;;  %v174_v6 = vcombine.high %v155_v48, %v155_v48  ;;  %v177_v8 = vcombine.high %v165_v52, %v165_v52 }
  0x12   :  { %v112_v63 = vadd.f32 %v106_v55, %v292_v14  ;;  %v113_v1 = vadd.f32 %v109_v59, %v36_v17  ;;  %v146_v10 = vmul.f32 %v144_v62, %v142_v61  ;;  %vm187_vm4 = vcmask 1041408  }
  0x13   :  { %v111_v9 = vadd.f32 %v110_v58, %v103_v2  ;;  %v172_v15 = vmul.f32 %v170_v4, %v168_v3  ;;  %vm204_vm5 = vcmask 1024  }
  0x14   :  { %v131_v5 = vadd.f32 %v129_v56, %v112_v63  ;;  %v141_v7 = vadd.f32 %v139_v57, %v113_v1 }
  0x15   :  { %v121_v13 = vadd.f32 %v120_v0, %v111_v9 }
  0x16   :  { %v157_v11 = vadd.f32 %v155_v48, %v131_v5  ;;  %v167_v12 = vadd.f32 %v165_v52, %v141_v7 }
  0x17   :  { %v147_v19 = vadd.f32 %v146_v10, %v121_v13 }
  0x18   :  { %v176_v16 = vadd.f32 %v174_v6, %v157_v11  ;;  %v179_v18 = vadd.f32 %v177_v8, %v167_v12 }
  0x19   :  { %v173_v20 = vadd.f32 %v172_v15, %v147_v19 }
  0x1a   :  { %181 = vst [vmem:[#allocation3] sm:$0x3] %v176_v16  ;;  %182 = vst [vmem:[#allocation4] sm:$0x3] %v179_v18 }
  0x1b   :  { %180 = vst [vmem:[#allocation2] sm:$0x3] %v173_v20 }
  0x21   :  { %v191_v14 = vld [vmem:[#allocation3] sm:$0x3]  ;;  %v195_v21 = vld [vmem:[#allocation4] sm:$0x3] }
  0x22   :  { %v192_v17 = vsel %vm187_vm4, %v191_v14, 0.0  ;;  %v196_v22 = vsel %vm187_vm4, %v195_v21, 0.0  ;;  %v186_v23 = vld [vmem:[#allocation2] sm:$0x3] }
  0x23   :  { %193 = vadd.xlane.f32.xlu0 %v192_v17  ;;  %v188_v24 = vsel %vm187_vm4, %v186_v23, 0.0 }
  0x24   :  { %189 = vadd.xlane.f32.xlu1 %v188_v24 }
  0x27   :  { %197 = vadd.xlane.f32.xlu0 %v196_v22 }
  0xb0   :  { %v194_v25 = vpop.xlane.xlu0 %193 }
  0xb1   :  { %v190_v29 = vpop.xlane.xlu1 %189 }
  0xb2   :  { %v199_v30 = vadd.f32 0.0001, %v190_v29 }
  0xb4   :  { %v198_v26 = vpop.xlane.xlu0 %197 }
  0xb5   :  { %v200_v27 = vadd.f32 %v198_v26, %v194_v25 }
  0xb7   :  { %v201_v28 = vadd.f32 0.0001, %v200_v27 }
  0xb9   :  { %240 = vrcp.f32 %v201_v28 }
  0xc3   :  { %v241_v31 = vpop.eup %240 }
  0xc4   :  { %v203_v32 = vmul.f32 %v241_v31, %v199_v30 }
  0xc6   :  { %v205_v33 = vsel %vm204_vm5, %v203_v32, 0.0 }
  0xc7   :  { %206 = vadd.xlane.f32.xlu1 %v205_v33 }
 0x154   :  { %v207_v34 = vpop.xlane.xlu1 %206 }
 0x155   :  { %v208_v35 = vrot.slane %v207_v34, 4 }
 0x157   :  { %v209_v36 = vadd.f32 %v208_v35, %v207_v34 }
 0x159   :  { %v210_v37 = vrot.slane %v209_v36, 2 }
 0x15b   :  { %v211_v38 = vadd.f32 %v210_v37, %v209_v36 }
 0x15d   :  { %v212_v39 = vrot.slane %v211_v38, 1 }
 0x15f   :  { %v213_v40 = vadd.f32 %v212_v39, %v211_v38 }
 0x161   :  { %235 = vpush %v213_v40 }
 0x192   :  { %s236_s0 = spop %235 }
 0x193   :  { %s215_s1 = smul.f32 2.0, %s236_s0 }
 0x195   :  { %s218_s2 = smul.f32 0.5, %s215_s1 }
 0x197   :  { %s219_s22 = ssub.f32 1.0, %s218_s2 }
 0x199   :  { %221 = sst [smem:[#allocation6]] %s219_s22 }
 0x19a   :  { %251 = shalt.err (!%p248_p2)
}
 0x19b   :  { %s256_s30 = smov [#allocation6]  }
 0x19c   :  { %229 = dma.smem_to_hbm %s256_s30, 16, %s317_s3, [#allocation7]  }
 0x19d   :  { %252 = dma.done.wait [#allocation7], 16  }
 0x19e   :  { %253 = vsyncadd [#allocation7], 4294967280 }
 0x19f   :  { %233 = sfence }
 0x1a0   :  { %234 = vsyncpa [#allocation7], 1 }

</bundles_post_ra>
